<compile_context>
chip_gen: v6e
topology: v6e:2x2x1
jax: 0.10.0
libtpu: 0.0.40
codegen_flags: <defaults>
</compile_context>

<pallas_src>
import math
import functools

import jax
import jax.numpy as jnp
from jax.experimental import pallas as pl
from jax.experimental.pallas import tpu as pltpu

_INV_SQRT2 = 1.0 / math.sqrt(2.0)
_LANE = 128      # pad all feature dims to a multiple of the 128-lane vreg width
_SUBLANE = 8     # f32 sublane packing; batch tiles are multiples of this


def _round_up(n, m):
    return ((n + m - 1) // m) * m


# --------------------------------------------------------------------------- #
# Kernel
# --------------------------------------------------------------------------- #
def adain_resblk_kernel(x_ref, s_ref,
                        g1w_ref, g1b_ref, be1w_ref, be1b_ref,
                        w1_ref, b1_ref,
                        g2w_ref, g2b_ref, be2w_ref, be2b_ref,
                        w2_ref, b2_ref,
                        out_ref,
                        *, fuse_shortcut, identity_shortcut):
    mxu_dt = w1_ref.dtype                      # bf16 weights -> bf16 MXU operands
    x = x_ref[...]
    xf = x.astype(jnp.float32)
    s_m = s_ref[...].astype(mxu_dt)

    # ---- norm1: AdaIN(style_dim, dim_in) (affine-only, per the spec) ----
    gamma1 = jnp.dot(s_m, g1w_ref[...], preferred_element_type=jnp.float32) + g1b_ref[...]
    beta1 = jnp.dot(s_m, be1w_ref[...], preferred_element_type=jnp.float32) + be1b_ref[...]
    t = (1.0 + gamma1) * xf + beta1
    t = jnp.where(t >= 0, t, 0.2 * t)          # LeakyReLU(0.2)

    # ---- conv1: Linear(dim_in, dim_out) ----
    t = jnp.dot(t.astype(mxu_dt), w1_ref[...],
                preferred_element_type=jnp.float32) + b1_ref[...]

    # ---- norm2: AdaIN(style_dim, dim_out) ----
    gamma2 = jnp.dot(s_m, g2w_ref[...], preferred_element_type=jnp.float32) + g2b_ref[...]
    beta2 = jnp.dot(s_m, be2w_ref[...], preferred_element_type=jnp.float32) + be2b_ref[...]
    t = (1.0 + gamma2) * t + beta2
    t = jnp.where(t >= 0, t, 0.2 * t)

    # ---- conv2 (+ fused shortcut) ----
    if fuse_shortcut:
        # [t | x] @ [w2 ; sc_w] == conv2(t) + conv1x1(x): one wider-K MXU matmul.
        # Both halves are 128-lane aligned (padded), so the concat is layout-free.
        lhs = jnp.concatenate([t.astype(mxu_dt), x.astype(mxu_dt)], axis=1)
        o = jnp.dot(lhs, w2_ref[...], preferred_element_type=jnp.float32) + b2_ref[...]
        o = o * _INV_SQRT2
    else:
        o = jnp.dot(t.astype(mxu_dt), w2_ref[...],
                    preferred_element_type=jnp.float32) + b2_ref[...]
        if identity_shortcut:
            o = (o + xf) * _INV_SQRT2

    out_ref[...] = o.astype(out_ref.dtype)


# --------------------------------------------------------------------------- #
# Wrapper
# --------------------------------------------------------------------------- #
def adain_resblk(x, s, kp, *, dim_in, dim_out, style_dim, w_hpf=0, block_b=512):
    """Forward pass of AdainResBlk as one batch-gridded Pallas kernel call.

    `kp` must come from prepare_params() (padded / split / fused layout)."""
    learned_sc = dim_in != dim_out
    fuse_shortcut = (w_hpf == 0) and learned_sc
    identity_shortcut = (w_hpf == 0) and not learned_sc

    B = x.shape[0]
    din_p = kp["w1"].shape[0]
    dout_p = kp["w1"].shape[1]
    s_p_dim = kp["g1_w"].shape[0]

    # Batch tile: multiple of 8 sublanes, as large as VMEM comfortably allows.
    tb = min(block_b, _round_up(B, _SUBLANE))
    b_pad = _round_up(B, tb)

    x_p = jnp.pad(x, ((0, b_pad - B), (0, din_p - dim_in)))
    s_pad = jnp.pad(s, ((0, b_pad - B), (0, s_p_dim - style_dim)))

    row_x = pl.BlockSpec((tb, din_p), lambda i: (i, 0))
    row_s = pl.BlockSpec((tb, s_p_dim), lambda i: (i, 0))
    row_o = pl.BlockSpec((tb, dout_p), lambda i: (i, 0))

    def resident(a):  # whole array, same block every grid step -> stays in VMEM
        return pl.BlockSpec(a.shape, lambda i: (0, 0))

    args = (x_p, s_pad,
            kp["g1_w"], kp["g1_b"], kp["be1_w"], kp["be1_b"],
            kp["w1"], kp["b1"],
            kp["g2_w"], kp["g2_b"], kp["be2_w"], kp["be2_b"],
            kp["w2"], kp["b2"])
    in_specs = [row_x, row_s] + [resident(a) for a in args[2:]]

    kernel = functools.partial(
        adain_resblk_kernel,
        fuse_shortcut=fuse_shortcut,
        identity_shortcut=identity_shortcut,
    )

    out_p = pl.pallas_call(
        kernel,
        out_shape=jax.ShapeDtypeStruct((b_pad, dout_p), x.dtype),
        grid=(pl.cdiv(b_pad, tb),),
        in_specs=in_specs,
        out_specs=row_o,
        compiler_params=pltpu.CompilerParams(
            dimension_semantics=("parallel",),       # v7x: shard batch over 2 TCs
            vmem_limit_bytes=48 * 1024 * 1024,       # > v5e 16MiB default, < v7x 64MiB
        ),
    )(*args)

    return out_p[:B, :dim_out]


# --------------------------------------------------------------------------- #
# Parameter construction
# --------------------------------------------------------------------------- #
def init_params(key, *, dim_in, dim_out, style_dim, dtype=jnp.float32):
    """torch.nn.Linear-style init: U(-1/sqrt(fan_in), 1/sqrt(fan_in)).
    Weights stored pre-transposed [in, out]; biases as [1, out]."""
    def linear(k, fan_in, fan_out, bias=True):
        kw, kb = jax.random.split(k)
        bound = 1.0 / math.sqrt(fan_in)
        w = jax.random.uniform(kw, (fan_in, fan_out), dtype, -bound, bound)
        b = (jax.random.uniform(kb, (1, fan_out), dtype, -bound, bound)
             if bias else jnp.zeros((1, fan_out), dtype))
        return w, b

    k = jax.random.split(key, 5)
    p = {}
    p["fc1_w"], p["fc1_b"] = linear(k[0], style_dim, 2 * dim_in)    # norm1.fc
    p["w1"], p["b1"] = linear(k[1], dim_in, dim_out)                # conv1
    p["fc2_w"], p["fc2_b"] = linear(k[2], style_dim, 2 * dim_out)   # norm2.fc
    p["w2"], p["b2"] = linear(k[3], dim_out, dim_out)               # conv2
    if dim_in != dim_out:
        p["sc_w"], _ = linear(k[4], dim_in, dim_out, bias=False)    # conv1x1
    return p


def prepare_params(raw, *, dim_in, dim_out, style_dim, w_hpf=0,
                   param_dtype=jnp.float32):
    """Kernel-ready params: gamma/beta split, 128-lane zero padding, learned
    shortcut fused into conv2's weight. Biases stay f32 (added post-accumulation)."""
    learned_sc = dim_in != dim_out
    din_p = _round_up(dim_in, _LANE)
    dout_p = _round_up(dim_out, _LANE)
    sd_p = _round_up(style_dim, _LANE)

    def pad_w(a, rows, cols):
        return jnp.pad(a, ((0, rows - a.shape[0]),
                           (0, cols - a.shape[1]))).astype(param_dtype)

    def pad_b(a, cols):
        return jnp.pad(a, ((0, 0), (0, cols - a.shape[1]))).astype(jnp.float32)

    kp = {
        "g1_w": pad_w(raw["fc1_w"][:, :dim_in], sd_p, din_p),
        "be1_w": pad_w(raw["fc1_w"][:, dim_in:], sd_p, din_p),
        "g1_b": pad_b(raw["fc1_b"][:, :dim_in], din_p),
        "be1_b": pad_b(raw["fc1_b"][:, dim_in:], din_p),
        "w1": pad_w(raw["w1"], din_p, dout_p),
        "b1": pad_b(raw["b1"], dout_p),
        "g2_w": pad_w(raw["fc2_w"][:, :dim_out], sd_p, dout_p),
        "be2_w": pad_w(raw["fc2_w"][:, dim_out:], sd_p, dout_p),
        "g2_b": pad_b(raw["fc2_b"][:, :dim_out], dout_p),
        "be2_b": pad_b(raw["fc2_b"][:, dim_out:], dout_p),
        "b2": pad_b(raw["b2"], dout_p),
    }
    w2 = pad_w(raw["w2"], dout_p, dout_p)
    if learned_sc and w_hpf == 0:
        sc_w = pad_w(raw["sc_w"], din_p, dout_p)
        w2 = jnp.concatenate([w2, sc_w], axis=0)   # [dout_p + din_p, dout_p]
    kp["w2"] = w2
    return kp


# --------------------------------------------------------------------------- #
# Pure-JAX reference (mirrors the torch forward)
# --------------------------------------------------------------------------- #
def reference_forward(x, s, p, *, dim_in, dim_out, w_hpf=0):
    learned_sc = dim_in != dim_out
    xf = x.astype(jnp.float32)
    sf = s.astype(jnp.float32)
    h1 = sf @ p["fc1_w"] + p["fc1_b"]
    t = (1.0 + h1[:, :dim_in]) * xf + h1[:, dim_in:]
    t = jnp.where(t >= 0, t, 0.2 * t)
    t = t @ p["w1"] + p["b1"]
    h2 = sf @ p["fc2_w"] + p["fc2_b"]
    t = (1.0 + h2[:, :dim_out]) * t + h2[:, dim_out:]
    t = jnp.where(t >= 0, t, 0.2 * t)
    t = t @ p["w2"] + p["b2"]
    if w_hpf == 0:
        sc = xf @ p["sc_w"] if learned_sc else xf
        t = (t + sc) / math.sqrt(2.0)
    return t.astype(x.dtype)


# --------------------------------------------------------------------------- #
if __name__ == "__main__":
    key = jax.random.PRNGKey(0)
    k1, k2, k3, k4 = jax.random.split(key, 4)

    # ---- Config A: learned shortcut (dim_in != dim_out), f32 weights ----
    B, dim_in, dim_out, style_dim, w_hpf = 8, 32, 64, 64, 0
    x = jax.random.normal(k1, (B, dim_in), jnp.float32)
    s = jax.random.normal(k2, (B, style_dim), jnp.float32)
    raw = init_params(k3, dim_in=dim_in, dim_out=dim_out, style_dim=style_dim)

    kp = prepare_params(raw, dim_in=dim_in, dim_out=dim_out, style_dim=style_dim,
                        w_hpf=w_hpf, param_dtype=jnp.float32)
    out = adain_resblk(x, s, kp, dim_in=dim_in, dim_out=dim_out,
                       style_dim=style_dim, w_hpf=w_hpf)
    out = jax.block_until_ready(out)
    ref = reference_forward(x, s, raw, dim_in=dim_in, dim_out=dim_out, w_hpf=w_hpf)
    assert out.shape == (B, dim_out)
    assert jnp.allclose(out, ref, atol=1e-5, rtol=1e-5), "A: mismatch (f32, learned sc)"

    # ---- Config B: identity shortcut (dim_in == dim_out), f32 weights ----
    dim_in_b = dim_out_b = 64
    xb = jax.random.normal(k4, (B, dim_in_b), jnp.float32)
    raw_b = init_params(k2, dim_in=dim_in_b, dim_out=dim_out_b, style_dim=style_dim)
    kp_b = prepare_params(raw_b, dim_in=dim_in_b, dim_out=dim_out_b,
                          style_dim=style_dim, w_hpf=w_hpf, param_dtype=jnp.float32)
    out_b = adain_resblk(xb, s, kp_b, dim_in=dim_in_b, dim_out=dim_out_b,
                         style_dim=style_dim, w_hpf=w_hpf)
    out_b = jax.block_until_ready(out_b)
    ref_b = reference_forward(xb, s, raw_b, dim_in=dim_in_b, dim_out=dim_out_b,
                              w_hpf=w_hpf)
    assert jnp.allclose(out_b, ref_b, atol=1e-5, rtol=1e-5), "B: mismatch (identity sc)"

    # ---- Config A with bf16 weights (bf16 MXU operands, f32 accumulation) ----
    kp_bf16 = prepare_params(raw, dim_in=dim_in, dim_out=dim_out,
                             style_dim=style_dim, w_hpf=w_hpf,
                             param_dtype=jnp.bfloat16)
    out_bf16 = adain_resblk(x, s, kp_bf16, dim_in=dim_in, dim_out=dim_out,
                            style_dim=style_dim, w_hpf=w_hpf)
    out_bf16 = jax.block_until_ready(out_bf16)
    assert jnp.allclose(out_bf16, ref, atol=1e-1, rtol=1e-1), "A: mismatch (bf16 MXU)"

    print("KERNEL_OK")
</pallas_src>

<mosaic_0001>
module attributes {stable_mosaic.version = 11 : i64} {
  func.func @adain_resblk_kernel(%arg0: i32, %arg1: memref<8x128xf32, #tpu.memory_space<vmem>>, %arg2: memref<8x128xf32, #tpu.memory_space<vmem>>, %arg3: memref<128x128xf32, #tpu.memory_space<vmem>>, %arg4: memref<1x128xf32, #tpu.memory_space<vmem>>, %arg5: memref<128x128xf32, #tpu.memory_space<vmem>>, %arg6: memref<1x128xf32, #tpu.memory_space<vmem>>, %arg7: memref<128x128xf32, #tpu.memory_space<vmem>>, %arg8: memref<1x128xf32, #tpu.memory_space<vmem>>, %arg9: memref<128x128xf32, #tpu.memory_space<vmem>>, %arg10: memref<1x128xf32, #tpu.memory_space<vmem>>, %arg11: memref<128x128xf32, #tpu.memory_space<vmem>>, %arg12: memref<1x128xf32, #tpu.memory_space<vmem>>, %arg13: memref<256x128xf32, #tpu.memory_space<vmem>>, %arg14: memref<1x128xf32, #tpu.memory_space<vmem>>, %arg15: memref<8x128xf32, #tpu.memory_space<vmem>>) attributes {dimension_semantics = [#tpu.dimension_semantics<parallel>], iteration_bounds = array<i64: 1>, scalar_prefetch = 0 : i64, scratch_operands = 0 : i64, tpu.core_type = #tpu.core_type<tc>, window_params = [{transform_indices = @transform_0, window_bounds = array<i64: 8, 128>}, {transform_indices = @transform_1, window_bounds = array<i64: 8, 128>}, {pipeline_mode = #tpu.pipeline_mode<synchronous>, transform_indices = @transform_2, window_bounds = array<i64: 128, 128>}, {pipeline_mode = #tpu.pipeline_mode<synchronous>, transform_indices = @transform_3, window_bounds = array<i64: 1, 128>}, {pipeline_mode = #tpu.pipeline_mode<synchronous>, transform_indices = @transform_4, window_bounds = array<i64: 128, 128>}, {pipeline_mode = #tpu.pipeline_mode<synchronous>, transform_indices = @transform_5, window_bounds = array<i64: 1, 128>}, {pipeline_mode = #tpu.pipeline_mode<synchronous>, transform_indices = @transform_6, window_bounds = array<i64: 128, 128>}, {pipeline_mode = #tpu.pipeline_mode<synchronous>, transform_indices = @transform_7, window_bounds = array<i64: 1, 128>}, {pipeline_mode = #tpu.pipeline_mode<synchronous>, transform_indices = @transform_8, window_bounds = array<i64: 128, 128>}, {pipeline_mode = #tpu.pipeline_mode<synchronous>, transform_indices = @transform_9, window_bounds = array<i64: 1, 128>}, {pipeline_mode = #tpu.pipeline_mode<synchronous>, transform_indices = @transform_10, window_bounds = array<i64: 128, 128>}, {pipeline_mode = #tpu.pipeline_mode<synchronous>, transform_indices = @transform_11, window_bounds = array<i64: 1, 128>}, {pipeline_mode = #tpu.pipeline_mode<synchronous>, transform_indices = @transform_12, window_bounds = array<i64: 256, 128>}, {pipeline_mode = #tpu.pipeline_mode<synchronous>, transform_indices = @transform_13, window_bounds = array<i64: 1, 128>}, {transform_indices = @transform_14, window_bounds = array<i64: 8, 128>}]} {
    %c0 = arith.constant 0 : index
    %c0_0 = arith.constant 0 : index
    %0 = vector.load %arg1[%c0, %c0_0] : memref<8x128xf32, #tpu.memory_space<vmem>>, vector<8x128xf32>
    %c0_1 = arith.constant 0 : index
    %c0_2 = arith.constant 0 : index
    %1 = vector.load %arg2[%c0_1, %c0_2] : memref<8x128xf32, #tpu.memory_space<vmem>>, vector<8x128xf32>
    %c0_3 = arith.constant 0 : index
    %c0_4 = arith.constant 0 : index
    %2 = vector.load %arg3[%c0_3, %c0_4] : memref<128x128xf32, #tpu.memory_space<vmem>>, vector<128x128xf32>
    %cst = arith.constant dense<0.000000e+00> : vector<8x128xf32>
    %3 = tpu.matmul %1, %2, %cst {dimension_numbers = #tpu.dot_dimension_numbers<[1], [0], [0], [1], [0, 0, 1, 1], [], []>} : vector<8x128xf32>, vector<128x128xf32>, vector<8x128xf32> -> vector<8x128xf32>
    %c0_5 = arith.constant 0 : index
    %c0_6 = arith.constant 0 : index
    %4 = vector.load %arg4[%c0_5, %c0_6] : memref<1x128xf32, #tpu.memory_space<vmem>>, vector<1x128xf32>
    %5 = vector.broadcast %4 : vector<1x128xf32> to vector<8x128xf32>
    %6 = arith.addf %3, %5 : vector<8x128xf32>
    %c0_7 = arith.constant 0 : index
    %c0_8 = arith.constant 0 : index
    %7 = vector.load %arg5[%c0_7, %c0_8] : memref<128x128xf32, #tpu.memory_space<vmem>>, vector<128x128xf32>
    %cst_9 = arith.constant dense<0.000000e+00> : vector<8x128xf32>
    %8 = tpu.matmul %1, %7, %cst_9 {dimension_numbers = #tpu.dot_dimension_numbers<[1], [0], [0], [1], [0, 0, 1, 1], [], []>} : vector<8x128xf32>, vector<128x128xf32>, vector<8x128xf32> -> vector<8x128xf32>
    %c0_10 = arith.constant 0 : index
    %c0_11 = arith.constant 0 : index
    %9 = vector.load %arg6[%c0_10, %c0_11] : memref<1x128xf32, #tpu.memory_space<vmem>>, vector<1x128xf32>
    %10 = vector.broadcast %9 : vector<1x128xf32> to vector<8x128xf32>
    %11 = arith.addf %8, %10 : vector<8x128xf32>
    %cst_12 = arith.constant 1.000000e+00 : f32
    %12 = vector.broadcast %cst_12 : f32 to vector<8x128xf32>
    %13 = arith.addf %12, %6 : vector<8x128xf32>
    %14 = arith.mulf %13, %0 : vector<8x128xf32>
    %15 = arith.addf %14, %11 : vector<8x128xf32>
    %cst_13 = arith.constant 0.000000e+00 : f32
    %16 = vector.broadcast %cst_13 : f32 to vector<8x128xf32>
    %17 = arith.cmpf oge, %15, %16 : vector<8x128xf32>
    %cst_14 = arith.constant 2.000000e-01 : f32
    %18 = vector.broadcast %cst_14 : f32 to vector<8x128xf32>
    %19 = arith.mulf %18, %15 : vector<8x128xf32>
    %20 = arith.select %17, %15, %19 : vector<8x128xi1>, vector<8x128xf32>
    %c0_15 = arith.constant 0 : index
    %c0_16 = arith.constant 0 : index
    %21 = vector.load %arg7[%c0_15, %c0_16] : memref<128x128xf32, #tpu.memory_space<vmem>>, vector<128x128xf32>
    %cst_17 = arith.constant dense<0.000000e+00> : vector<8x128xf32>
    %22 = tpu.matmul %20, %21, %cst_17 {dimension_numbers = #tpu.dot_dimension_numbers<[1], [0], [0], [1], [0, 0, 1, 1], [], []>} : vector<8x128xf32>, vector<128x128xf32>, vector<8x128xf32> -> vector<8x128xf32>
    %c0_18 = arith.constant 0 : index
    %c0_19 = arith.constant 0 : index
    %23 = vector.load %arg8[%c0_18, %c0_19] : memref<1x128xf32, #tpu.memory_space<vmem>>, vector<1x128xf32>
    %24 = vector.broadcast %23 : vector<1x128xf32> to vector<8x128xf32>
    %25 = arith.addf %22, %24 : vector<8x128xf32>
    %c0_20 = arith.constant 0 : index
    %c0_21 = arith.constant 0 : index
    %26 = vector.load %arg9[%c0_20, %c0_21] : memref<128x128xf32, #tpu.memory_space<vmem>>, vector<128x128xf32>
    %cst_22 = arith.constant dense<0.000000e+00> : vector<8x128xf32>
    %27 = tpu.matmul %1, %26, %cst_22 {dimension_numbers = #tpu.dot_dimension_numbers<[1], [0], [0], [1], [0, 0, 1, 1], [], []>} : vector<8x128xf32>, vector<128x128xf32>, vector<8x128xf32> -> vector<8x128xf32>
    %c0_23 = arith.constant 0 : index
    %c0_24 = arith.constant 0 : index
    %28 = vector.load %arg10[%c0_23, %c0_24] : memref<1x128xf32, #tpu.memory_space<vmem>>, vector<1x128xf32>
    %29 = vector.broadcast %28 : vector<1x128xf32> to vector<8x128xf32>
    %30 = arith.addf %27, %29 : vector<8x128xf32>
    %c0_25 = arith.constant 0 : index
    %c0_26 = arith.constant 0 : index
    %31 = vector.load %arg11[%c0_25, %c0_26] : memref<128x128xf32, #tpu.memory_space<vmem>>, vector<128x128xf32>
    %cst_27 = arith.constant dense<0.000000e+00> : vector<8x128xf32>
    %32 = tpu.matmul %1, %31, %cst_27 {dimension_numbers = #tpu.dot_dimension_numbers<[1], [0], [0], [1], [0, 0, 1, 1], [], []>} : vector<8x128xf32>, vector<128x128xf32>, vector<8x128xf32> -> vector<8x128xf32>
    %c0_28 = arith.constant 0 : index
    %c0_29 = arith.constant 0 : index
    %33 = vector.load %arg12[%c0_28, %c0_29] : memref<1x128xf32, #tpu.memory_space<vmem>>, vector<1x128xf32>
    %34 = vector.broadcast %33 : vector<1x128xf32> to vector<8x128xf32>
    %35 = arith.addf %32, %34 : vector<8x128xf32>
    %cst_30 = arith.constant 1.000000e+00 : f32
    %36 = vector.broadcast %cst_30 : f32 to vector<8x128xf32>
    %37 = arith.addf %36, %30 : vector<8x128xf32>
    %38 = arith.mulf %37, %25 : vector<8x128xf32>
    %39 = arith.addf %38, %35 : vector<8x128xf32>
    %cst_31 = arith.constant 0.000000e+00 : f32
    %40 = vector.broadcast %cst_31 : f32 to vector<8x128xf32>
    %41 = arith.cmpf oge, %39, %40 : vector<8x128xf32>
    %cst_32 = arith.constant 2.000000e-01 : f32
    %42 = vector.broadcast %cst_32 : f32 to vector<8x128xf32>
    %43 = arith.mulf %42, %39 : vector<8x128xf32>
    %44 = arith.select %41, %39, %43 : vector<8x128xi1>, vector<8x128xf32>
    %45 = tpu.concatenate %44, %0 in 1 : vector<8x128xf32>, vector<8x128xf32> -> vector<8x256xf32>
    %c0_33 = arith.constant 0 : index
    %c0_34 = arith.constant 0 : index
    %46 = vector.load %arg13[%c0_33, %c0_34] : memref<256x128xf32, #tpu.memory_space<vmem>>, vector<256x128xf32>
    %cst_35 = arith.constant dense<0.000000e+00> : vector<8x128xf32>
    %47 = tpu.matmul %45, %46, %cst_35 {dimension_numbers = #tpu.dot_dimension_numbers<[1], [0], [0], [1], [0, 0, 1, 1], [], []>} : vector<8x256xf32>, vector<256x128xf32>, vector<8x128xf32> -> vector<8x128xf32>
    %c0_36 = arith.constant 0 : index
    %c0_37 = arith.constant 0 : index
    %48 = vector.load %arg14[%c0_36, %c0_37] : memref<1x128xf32, #tpu.memory_space<vmem>>, vector<1x128xf32>
    %49 = vector.broadcast %48 : vector<1x128xf32> to vector<8x128xf32>
    %50 = arith.addf %47, %49 : vector<8x128xf32>
    %cst_38 = arith.constant 0.707106769 : f32
    %51 = vector.broadcast %cst_38 : f32 to vector<8x128xf32>
    %52 = arith.mulf %50, %51 : vector<8x128xf32>
    %c0_39 = arith.constant 0 : index
    %c0_40 = arith.constant 0 : index
    %53 = vector.load %arg15[%c0_39, %c0_40] : memref<8x128xf32, #tpu.memory_space<vmem>>, vector<8x128xf32>
    tpu.vector_store %arg15[%c0_39, %c0_40], %52 {strides = array<i32>} : memref<8x128xf32, #tpu.memory_space<vmem>>, vector<8x128xf32>,
    return
  }
  func.func @transform_0(%arg0: i32) -> (i32, i32) {
    %c0_i32 = arith.constant 0 : i32
    %c0_i32_0 = arith.constant 0 : i32
    return %arg0, %c0_i32 : i32, i32
  }
  func.func @transform_1(%arg0: i32) -> (i32, i32) {
    %c0_i32 = arith.constant 0 : i32
    %c0_i32_0 = arith.constant 0 : i32
    return %arg0, %c0_i32 : i32, i32
  }
  func.func @transform_2(%arg0: i32) -> (i32, i32) {
    %c0_i32 = arith.constant 0 : i32
    %c0_i32_0 = arith.constant 0 : i32
    %c0_i32_1 = arith.constant 0 : i32
    return %c0_i32, %c0_i32_0 : i32, i32
  }
  func.func @transform_3(%arg0: i32) -> (i32, i32) {
    %c0_i32 = arith.constant 0 : i32
    %c0_i32_0 = arith.constant 0 : i32
    %c0_i32_1 = arith.constant 0 : i32
    return %c0_i32, %c0_i32_0 : i32, i32
  }
  func.func @transform_4(%arg0: i32) -> (i32, i32) {
    %c0_i32 = arith.constant 0 : i32
    %c0_i32_0 = arith.constant 0 : i32
    %c0_i32_1 = arith.constant 0 : i32
    return %c0_i32, %c0_i32_0 : i32, i32
  }
  func.func @transform_5(%arg0: i32) -> (i32, i32) {
    %c0_i32 = arith.constant 0 : i32
    %c0_i32_0 = arith.constant 0 : i32
    %c0_i32_1 = arith.constant 0 : i32
    return %c0_i32, %c0_i32_0 : i32, i32
  }
  func.func @transform_6(%arg0: i32) -> (i32, i32) {
    %c0_i32 = arith.constant 0 : i32
    %c0_i32_0 = arith.constant 0 : i32
    %c0_i32_1 = arith.constant 0 : i32
    return %c0_i32, %c0_i32_0 : i32, i32
  }
  func.func @transform_7(%arg0: i32) -> (i32, i32) {
    %c0_i32 = arith.constant 0 : i32
    %c0_i32_0 = arith.constant 0 : i32
    %c0_i32_1 = arith.constant 0 : i32
    return %c0_i32, %c0_i32_0 : i32, i32
  }
  func.func @transform_8(%arg0: i32) -> (i32, i32) {
    %c0_i32 = arith.constant 0 : i32
    %c0_i32_0 = arith.constant 0 : i32
    %c0_i32_1 = arith.constant 0 : i32
    return %c0_i32, %c0_i32_0 : i32, i32
  }
  func.func @transform_9(%arg0: i32) -> (i32, i32) {
    %c0_i32 = arith.constant 0 : i32
    %c0_i32_0 = arith.constant 0 : i32
    %c0_i32_1 = arith.constant 0 : i32
    return %c0_i32, %c0_i32_0 : i32, i32
  }
  func.func @transform_10(%arg0: i32) -> (i32, i32) {
    %c0_i32 = arith.constant 0 : i32
    %c0_i32_0 = arith.constant 0 : i32
    %c0_i32_1 = arith.constant 0 : i32
    return %c0_i32, %c0_i32_0 : i32, i32
  }
  func.func @transform_11(%arg0: i32) -> (i32, i32) {
    %c0_i32 = arith.constant 0 : i32
    %c0_i32_0 = arith.constant 0 : i32
    %c0_i32_1 = arith.constant 0 : i32
    return %c0_i32, %c0_i32_0 : i32, i32
  }
  func.func @transform_12(%arg0: i32) -> (i32, i32) {
    %c0_i32 = arith.constant 0 : i32
    %c0_i32_0 = arith.constant 0 : i32
    %c0_i32_1 = arith.constant 0 : i32
    return %c0_i32, %c0_i32_0 : i32, i32
  }
  func.func @transform_13(%arg0: i32) -> (i32, i32) {
    %c0_i32 = arith.constant 0 : i32
    %c0_i32_0 = arith.constant 0 : i32
    %c0_i32_1 = arith.constant 0 : i32
    return %c0_i32, %c0_i32_0 : i32, i32
  }
  func.func @transform_14(%arg0: i32) -> (i32, i32) {
    %c0_i32 = arith.constant 0 : i32
    %c0_i32_0 = arith.constant 0 : i32
    return %arg0, %c0_i32 : i32, i32
  }
}

</mosaic_0001>

<bundles_post_ra>
// kernel: tpu_custom_call.1
= control target key start
LH: loop header
LB: loop body
LE: loop exit
PB: predicated region body
PF: predicated region fallthrough
CT: control target
= control target key end

     0   :  { %19 = vsyncpa [#allocation3], 0  ;;  %s1518_s0 = inlined_call_operand.hbm [shape: f32[8,128], index: 0, kind: input, shape index: {}]   ;;  %s1519_s1 = inlined_call_operand.hbm [shape: f32[8,128], index: 1, kind: input, shape index: {}]   ;;  %s1520_s2 = inlined_call_operand.hbm [shape: f32[128,128], index: 2, kind: input, shape index: {}]   ;;  %s1521_s3 = inlined_call_operand.vmem [shape: f32[1,128], index: 3, kind: input, shape index: {}]   ;;  %s1522_s4 = inlined_call_operand.hbm [shape: f32[128,128], index: 4, kind: input, shape index: {}]   ;;  %s1523_s5 = inlined_call_operand.vmem [shape: f32[1,128], index: 5, kind: input, shape index: {}]   ;;  %s1524_s6 = inlined_call_operand.hbm [shape: f32[128,128], index: 6, kind: input, shape index: {}]   ;;  %s1525_s7 = inlined_call_operand.vmem [shape: f32[1,128], index: 7, kind: input, shape index: {}]   ;;  %s1526_s8 = inlined_call_operand.hbm [shape: f32[128,128], index: 8, kind: input, shape index: {}]   ;;  %s1527_s9 = inlined_call_operand.vmem [shape: f32[1,128], index: 9, kind: input, shape index: {}]   ;;  %s1528_s10 = inlined_call_operand.hbm [shape: f32[128,128], index: 10, kind: input, shape index: {}]   ;;  %s1529_s11 = inlined_call_operand.vmem [shape: f32[1,128], index: 11, kind: input, shape index: {}]   ;;  %s1530_s12 = inlined_call_operand.hbm [shape: f32[256,128], index: 12, kind: input, shape index: {}]   ;;  %s1531_s13 = inlined_call_operand.vmem [shape: f32[1,128], index: 13, kind: input, shape index: {}]   ;;  %s1532_s14 = inlined_call_operand.hbm [shape: f32[8,128], index: 14, kind: output, shape index: {}]  }
   0x1   :  { %20 = vsyncpa [#allocation6], 0 }
   0x2   :  { %21 = vsyncpa [#allocation9], 0 }
   0x3   :  { %22 = vsyncpa [#allocation12], 0 }
   0x4   :  { %23 = vsyncpa [#allocation15], 0 }
   0x5   :  { %24 = vsyncpa [#allocation4], 0  ;;  %s1268_s29 = smov [#allocation5]  }
   0x6   :  { %s41_s30 = sshll.u32 %s1268_s29, 4  ;;  %s42_s30 = int_to_ptr.vmem [resolvable:$true] %s41_s30 }
   0x7   :  { %s1084_s15 = scalar_lea.vmem %s42_s30, 128  ;;  %p1089_p1 = scmp.lt.s32.totalorder %s42_s30, %s42_s30 }
   0x8   :  { %p1085_p0 = scmp.ne.s32.totalorder %s42_s30, %s1084_s15  ;;  %p1090_p2 = scmp.lt.s32.totalorder %s1084_s15, %s1084_s15 }
   0xa   :  { %p1091_p3 = por %p1090_p2, %p1089_p1 }
   0xc   :  { %p1092_p4 = pnand %p1091_p3, %p1085_p0 }
   0xe   :  { %1095 = shalt.err (!%p1092_p4)
}
   0xf   :  { %44 = dma.hbm_to_vmem [thread:$0]  %s1519_s1, 128, %s42_s30, [#allocation6]  }
  0x10   :  { %s1269_s18 = smov [#allocation8]   ;;  %s1270_s20 = smov [#allocation11]  }
  0x11   :  { %s64_s19 = sshll.u32 %s1269_s18, 4  ;;  %s92_s21 = sshll.u32 %s1270_s20, 4  ;;  %s65_s19 = int_to_ptr.vmem [resolvable:$true] %s64_s19  ;;  %s93_s21 = int_to_ptr.vmem [resolvable:$true] %s92_s21 }
  0x12   :  { %s1104_s22 = scalar_lea.vmem %s65_s19, 2048  ;;  %p1109_p6 = scmp.lt.s32.totalorder %s65_s19, %s65_s19 }
  0x13   :  { %p1105_p5 = scmp.ne.s32.totalorder %s65_s19, %s1104_s22  ;;  %p1110_p7 = scmp.lt.s32.totalorder %s1104_s22, %s1104_s22 }
  0x15   :  { %p1111_p8 = por %p1110_p7, %p1109_p6 }
  0x17   :  { %p1112_p9 = pnand %p1111_p8, %p1105_p5 }
  0x19   :  { %1115 = shalt.err (!%p1112_p9)
}
  0x1a   :  { %s1271_s23 = smov 128   ;;  %s1272_s24 = smov 8  }
  0x1b   :  { %70 = dma.hbm_to_vmem [thread:$0]  %s1522_s4, 2048, %s65_s19, [#allocation9], %s1271_s23, %s1271_s23, %s1272_s24  }
  0x1c   :  { %s1124_s1 = scalar_lea.vmem %s93_s21, 2048  ;;  %p1129_p11 = scmp.lt.s32.totalorder %s93_s21, %s93_s21 }
  0x1d   :  { %p1125_p10 = scmp.ne.s32.totalorder %s93_s21, %s1124_s1  ;;  %p1130_p12 = scmp.lt.s32.totalorder %s1124_s1, %s1124_s1 }
  0x1f   :  { %p1131_p13 = por %p1130_p12, %p1129_p11 }
  0x21   :  { %p1132_p0 = pnand %p1131_p13, %p1125_p10 }
  0x23   :  { %1135 = shalt.err (!%p1132_p0)
}
  0x24   :  { %98 = dma.hbm_to_vmem [thread:$0]  %s1526_s8, 2048, %s93_s21, [#allocation12], %s1271_s23, %s1271_s23, %s1272_s24  }
  0x25   :  { %s1273_s29 = smov [#allocation2]   ;;  %s1274_s15 = smov [#allocation7]  }
  0x26   :  { %s31_s30 = sshll.u32 %s1273_s29, 4  ;;  %s50_s4 = sshll.u32 %s1274_s15, 4  ;;  %s32_s30 = int_to_ptr.vmem [resolvable:$true] %s31_s30  ;;  %s51_s4 = int_to_ptr.vmem [resolvable:$true] %s50_s4 }
  0x27   :  { %s1144_s16 = scalar_lea.vmem %s32_s30, 128  ;;  %p1149_p2 = scmp.lt.s32.totalorder %s32_s30, %s32_s30 }
  0x28   :  { %p1145_p1 = scmp.ne.s32.totalorder %s32_s30, %s1144_s16  ;;  %p1150_p3 = scmp.lt.s32.totalorder %s1144_s16, %s1144_s16 }
  0x2a   :  { %p1151_p4 = por %p1150_p3, %p1149_p2 }
  0x2c   :  { %p1152_p5 = pnand %p1151_p4, %p1145_p1 }
  0x2e   :  { %1155 = shalt.err (!%p1152_p5)
}
  0x2f   :  { %34 = dma.hbm_to_vmem [thread:$0]  %s1518_s0, 128, %s32_s30, [#allocation3]  }
  0x30   :  { %s1164_s19 = scalar_lea.vmem %s51_s4, 2048  ;;  %p1169_p7 = scmp.lt.s32.totalorder %s51_s4, %s51_s4 }
  0x31   :  { %p1165_p6 = scmp.ne.s32.totalorder %s51_s4, %s1164_s19  ;;  %p1170_p8 = scmp.lt.s32.totalorder %s1164_s19, %s1164_s19 }
  0x33   :  { %p1171_p9 = por %p1170_p8, %p1169_p7 }
  0x35   :  { %p1172_p10 = pnand %p1171_p9, %p1165_p6 }
  0x37   :  { %1175 = shalt.err (!%p1172_p10)
}
  0x38   :  { %56 = dma.hbm_to_vmem [thread:$0]  %s1520_s2, 2048, %s51_s4, [#allocation6], %s1271_s23, %s1271_s23, %s1272_s24  }
  0x39   :  { %s1275_s21 = smov [#allocation10]   ;;  %s1276_s25 = smov [#allocation13]  }
  0x3a   :  { %s78_s22 = sshll.u32 %s1275_s21, 4  ;;  %s106_s0 = sshll.u32 %s1276_s25, 4  ;;  %s79_s22 = int_to_ptr.vmem [resolvable:$true] %s78_s22  ;;  %s107_s0 = int_to_ptr.vmem [resolvable:$true] %s106_s0 }
  0x3b   :  { %s1184_s26 = scalar_lea.vmem %s79_s22, 2048  ;;  %p1189_p12 = scmp.lt.s32.totalorder %s79_s22, %s79_s22 }
  0x3c   :  { %p1185_p11 = scmp.ne.s32.totalorder %s79_s22, %s1184_s26  ;;  %p1190_p13 = scmp.lt.s32.totalorder %s1184_s26, %s1184_s26 }
  0x3e   :  { %p1191_p0 = por %p1190_p13, %p1189_p12 }
  0x40   :  { %p1192_p1 = pnand %p1191_p0, %p1185_p11 }
  0x42   :  { %1195 = shalt.err (!%p1192_p1)
}
  0x43   :  { %84 = dma.hbm_to_vmem [thread:$0]  %s1524_s6, 2048, %s79_s22, [#allocation9], %s1271_s23, %s1271_s23, %s1272_s24  }
  0x44   :  { %s1204_s2 = scalar_lea.vmem %s107_s0, 2048  ;;  %p1209_p3 = scmp.lt.s32.totalorder %s107_s0, %s107_s0 }
  0x45   :  { %p1205_p2 = scmp.ne.s32.totalorder %s107_s0, %s1204_s2  ;;  %p1210_p4 = scmp.lt.s32.totalorder %s1204_s2, %s1204_s2 }
  0x47   :  { %p1211_p5 = por %p1210_p4, %p1209_p3 }
  0x49   :  { %p1212_p6 = pnand %p1211_p5, %p1205_p2 }
  0x4b   :  { %1215 = shalt.err (!%p1212_p6)
}
  0x4c   :  { %112 = dma.hbm_to_vmem [thread:$0]  %s1528_s10, 2048, %s107_s0, [#allocation12], %s1271_s23, %s1271_s23, %s1272_s24  }
  0x4d   :  { %s1277_s30 = smov [#allocation14]  }
  0x4e   :  { %s120_s15 = sshll.u32 %s1277_s30, 4  ;;  %s121_s15 = int_to_ptr.vmem [resolvable:$true] %s120_s15 }
  0x4f   :  { %s1224_s4 = scalar_lea.vmem %s121_s15, 4096  ;;  %p1229_p8 = scmp.lt.s32.totalorder %s121_s15, %s121_s15 }
  0x50   :  { %p1225_p7 = scmp.ne.s32.totalorder %s121_s15, %s1224_s4  ;;  %p1230_p9 = scmp.lt.s32.totalorder %s1224_s4, %s1224_s4 }
  0x52   :  { %p1231_p10 = por %p1230_p9, %p1229_p8 }
  0x54   :  { %p1232_p11 = pnand %p1231_p10, %p1225_p7 }
  0x56   :  { %1235 = shalt.err (!%p1232_p11)
}
  0x57   :  { %126 = dma.hbm_to_vmem [thread:$0]  %s1530_s12, 4096, %s121_s15, [#allocation15], %s1271_s23, %s1271_s23, %s1272_s24  }
  0x58   :  { %1256 = dma.done.wait [#allocation3], 128  }
  0x59   :  { %1257 = vsyncadd [#allocation3], 4294967168 }
  0x5a   :  { %1258 = dma.done.wait [#allocation6], 2176  }
  0x5b   :  { %1259 = vsyncadd [#allocation6], 4294965120 }
  0x5c   :  { %1260 = dma.done.wait [#allocation9], 4096  }
  0x5d   :  { %1261 = vsyncadd [#allocation9], 4294963200 }
  0x5e   :  { %1262 = dma.done.wait [#allocation12], 4096  }
  0x5f   :  { %1263 = vsyncadd [#allocation12], 4294963200 }
  0x60   :  { %1264 = dma.done.wait [#allocation15], 4096  }
  0x61   :  { %1265 = vsyncadd [#allocation15], 4294963200  ;;  %v1278_v0 = vmov 0.0   ;;  %vm1279_vm0 = vmmov 0   ;;  %v170_v1 = vld [vmem:[#allocation7 + $0x78] sm:$0xff]  ;;  %v169_v2 = vld [vmem:[#allocation7 + $0x70] sm:$0xff] }
  0x62   :  { %888 = vmatprep.subr.mxu0 %v1278_v0  ;;  %923 = vmatprep.subr.mxu1 %v1278_v0  ;;  %v263_v3 = vld [vmem:[#allocation8 + $0x78] sm:$0xff]  ;;  %v262_v4 = vld [vmem:[#allocation8 + $0x70] sm:$0xff]  ;;  %v168_v5 = vld [vmem:[#allocation7 + $0x68] sm:$0xff] }
  0x63   :  { %920 = vmatprep.mubr.msk.f32.mxu0 %vm1279_vm0, %v1278_v0  ;;  %955 = vmatprep.mubr.msk.f32.mxu1 %vm1279_vm0, %v1278_v0  ;;  %v261_v6 = vld [vmem:[#allocation8 + $0x68] sm:$0xff]  ;;  %v167_v7 = vld [vmem:[#allocation7 + $0x60] sm:$0xff]  ;;  %v166_v9 = vld [vmem:[#allocation7 + $0x58] sm:$0xff] }
  0x64   :  { %889 = vmatpush3.msra.mxu0 %v170_v1  ;;  %924 = vmatpush3.msra.mxu1 %v263_v3  ;;  %v260_v8 = vld [vmem:[#allocation8 + $0x60] sm:$0xff]  ;;  %v259_v10 = vld [vmem:[#allocation8 + $0x58] sm:$0xff]  ;;  %v165_v11 = vld [vmem:[#allocation7 + $0x50] sm:$0xff] }
  0x65   :  { %890 = vmatprep.subr.mxu0 %v1278_v0  ;;  %925 = vmatprep.subr.mxu1 %v1278_v0  ;;  %v258_v12 = vld [vmem:[#allocation8 + $0x50] sm:$0xff]  ;;  %v164_v13 = vld [vmem:[#allocation7 + $0x48] sm:$0xff]  ;;  %v163_v15 = vld [vmem:[#allocation7 + $0x40] sm:$0xff] }
  0x66   :  { %891 = vmatpush3.msra.mxu0 %v169_v2  ;;  %926 = vmatpush3.msra.mxu1 %v262_v4  ;;  %v257_v14 = vld [vmem:[#allocation8 + $0x48] sm:$0xff]  ;;  %v256_v16 = vld [vmem:[#allocation8 + $0x40] sm:$0xff]  ;;  %v162_v17 = vld [vmem:[#allocation7 + $0x38] sm:$0xff] }
  0x67   :  { %892 = vmatprep.subr.mxu0 %v1278_v0  ;;  %927 = vmatprep.subr.mxu1 %v1278_v0  ;;  %v255_v18 = vld [vmem:[#allocation8 + $0x38] sm:$0xff]  ;;  %v161_v19 = vld [vmem:[#allocation7 + $0x30] sm:$0xff]  ;;  %v160_v21 = vld [vmem:[#allocation7 + $0x28] sm:$0xff] }
  0x68   :  { %893 = vmatpush3.msra.mxu0 %v168_v5  ;;  %928 = vmatpush3.msra.mxu1 %v261_v6  ;;  %v254_v20 = vld [vmem:[#allocation8 + $0x30] sm:$0xff]  ;;  %v253_v22 = vld [vmem:[#allocation8 + $0x28] sm:$0xff]  ;;  %v159_v23 = vld [vmem:[#allocation7 + $0x20] sm:$0xff] }
  0x69   :  { %894 = vmatprep.subr.mxu0 %v1278_v0  ;;  %929 = vmatprep.subr.mxu1 %v1278_v0  ;;  %v252_v24 = vld [vmem:[#allocation8 + $0x20] sm:$0xff]  ;;  %v158_v25 = vld [vmem:[#allocation7 + $0x18] sm:$0xff]  ;;  %v157_v27 = vld [vmem:[#allocation7 + $0x10] sm:$0xff] }
  0x6a   :  { %895 = vmatpush3.msra.mxu0 %v167_v7  ;;  %930 = vmatpush3.msra.mxu1 %v260_v8  ;;  %v251_v26 = vld [vmem:[#allocation8 + $0x18] sm:$0xff]  ;;  %v250_v28 = vld [vmem:[#allocation8 + $0x10] sm:$0xff]  ;;  %v156_v29 = vld [vmem:[#allocation7 + $0x8] sm:$0xff] }
  0x6b   :  { %896 = vmatprep.subr.mxu0 %v1278_v0  ;;  %931 = vmatprep.subr.mxu1 %v1278_v0  ;;  %v249_v30 = vld [vmem:[#allocation8 + $0x8] sm:$0xff]  ;;  %v155_v31 = vld [vmem:[#allocation7] sm:$0xff]  ;;  %v1432_v33 = vld [vmem:[#allocation5] sm:$0xff] }
  0x6c   :  { %897 = vmatpush3.msra.mxu0 %v166_v9  ;;  %932 = vmatpush3.msra.mxu1 %v259_v10  ;;  %v248_v32 = vld [vmem:[#allocation8] sm:$0xff]  ;;  %v455_v34 = vld [vmem:[#allocation11 + $0x78] sm:$0xff]  ;;  %v454_v36 = vld [vmem:[#allocation11 + $0x70] sm:$0xff] }
  0x6d   :  { %898 = vmatprep.subr.mxu0 %v1278_v0  ;;  %933 = vmatprep.subr.mxu1 %v1278_v0  ;;  %v362_v35 = vld [vmem:[#allocation10 + $0x78] sm:$0xff]  ;;  %v361_v37 = vld [vmem:[#allocation10 + $0x70] sm:$0xff]  ;;  %v453_v38 = vld [vmem:[#allocation11 + $0x68] sm:$0xff] }
  0x6e   :  { %899 = vmatpush3.msra.mxu0 %v165_v11  ;;  %934 = vmatpush3.msra.mxu1 %v258_v12  ;;  %v360_v39 = vld [vmem:[#allocation10 + $0x68] sm:$0xff]  ;;  %v452_v40 = vld [vmem:[#allocation11 + $0x60] sm:$0xff]  ;;  %v451_v42 = vld [vmem:[#allocation11 + $0x58] sm:$0xff] }
  0x6f   :  { %900 = vmatprep.subr.mxu0 %v1278_v0  ;;  %935 = vmatprep.subr.mxu1 %v1278_v0  ;;  %v359_v41 = vld [vmem:[#allocation10 + $0x60] sm:$0xff]  ;;  %v358_v43 = vld [vmem:[#allocation10 + $0x58] sm:$0xff]  ;;  %v450_v44 = vld [vmem:[#allocation11 + $0x50] sm:$0xff] }
  0x70   :  { %901 = vmatpush3.msra.mxu0 %v164_v13  ;;  %936 = vmatpush3.msra.mxu1 %v257_v14  ;;  %v357_v45 = vld [vmem:[#allocation10 + $0x50] sm:$0xff]  ;;  %v449_v46 = vld [vmem:[#allocation11 + $0x48] sm:$0xff]  ;;  %v448_v48 = vld [vmem:[#allocation11 + $0x40] sm:$0xff] }
  0x71   :  { %902 = vmatprep.subr.mxu0 %v1278_v0  ;;  %937 = vmatprep.subr.mxu1 %v1278_v0  ;;  %v356_v47 = vld [vmem:[#allocation10 + $0x48] sm:$0xff]  ;;  %v355_v49 = vld [vmem:[#allocation10 + $0x40] sm:$0xff]  ;;  %v447_v50 = vld [vmem:[#allocation11 + $0x38] sm:$0xff] }
  0x72   :  { %903 = vmatpush3.msra.mxu0 %v163_v15  ;;  %938 = vmatpush3.msra.mxu1 %v256_v16  ;;  %v354_v51 = vld [vmem:[#allocation10 + $0x38] sm:$0xff]  ;;  %v446_v52 = vld [vmem:[#allocation11 + $0x30] sm:$0xff]  ;;  %v445_v54 = vld [vmem:[#allocation11 + $0x28] sm:$0xff] }
  0x73   :  { %904 = vmatprep.subr.mxu0 %v1278_v0  ;;  %939 = vmatprep.subr.mxu1 %v1278_v0  ;;  %v353_v53 = vld [vmem:[#allocation10 + $0x30] sm:$0xff]  ;;  %v352_v55 = vld [vmem:[#allocation10 + $0x28] sm:$0xff]  ;;  %v444_v56 = vld [vmem:[#allocation11 + $0x20] sm:$0xff] }
  0x74   :  { %905 = vmatpush3.msra.mxu0 %v162_v17  ;;  %940 = vmatpush3.msra.mxu1 %v255_v18  ;;  %v351_v57 = vld [vmem:[#allocation10 + $0x20] sm:$0xff]  ;;  %v443_v58 = vld [vmem:[#allocation11 + $0x18] sm:$0xff]  ;;  %v442_v60 = vld [vmem:[#allocation11 + $0x10] sm:$0xff] }
  0x75   :  { %906 = vmatprep.subr.mxu0 %v1278_v0  ;;  %941 = vmatprep.subr.mxu1 %v1278_v0  ;;  %v350_v59 = vld [vmem:[#allocation10 + $0x18] sm:$0xff]  ;;  %v349_v61 = vld [vmem:[#allocation10 + $0x10] sm:$0xff]  ;;  %v441_v62 = vld [vmem:[#allocation11 + $0x8] sm:$0xff] }
  0x76   :  { %907 = vmatpush3.msra.mxu0 %v161_v19  ;;  %942 = vmatpush3.msra.mxu1 %v254_v20  ;;  %v348_v63 = vld [vmem:[#allocation10 + $0x8] sm:$0xff]  ;;  %v440_v1 = vld [vmem:[#allocation11] sm:$0xff]  ;;  %v153_v3 = vld [vmem:[#allocation2] sm:$0xff] }
  0x77   :  { %908 = vmatprep.subr.mxu0 %v1278_v0  ;;  %943 = vmatprep.subr.mxu1 %v1278_v0  ;;  %v347_v2 = vld [vmem:[#allocation10] sm:$0xff]  ;;  %v762_v4 = vld [vmem:[%s1521_s3] ss:$0 sm:$0xff]  ;;  %v548_v16 = vld [vmem:[#allocation13 + $0x78] sm:$0xff] }
  0x78   :  { %909 = vmatpush3.msra.mxu0 %v160_v21  ;;  %944 = vmatpush3.msra.mxu1 %v253_v22  ;;  %v763_v6 = vld [vmem:[%s1523_s5] ss:$0 sm:$0xff]  ;;  %v546_v19 = vld [vmem:[#allocation13 + $0x68] sm:$0xff]  ;;  %v545_v20 = vld [vmem:[#allocation13 + $0x60] sm:$0xff] }
  0x79   :  { %910 = vmatprep.subr.mxu0 %v1278_v0  ;;  %945 = vmatprep.subr.mxu1 %v1278_v0  ;;  %v547_v18 = vld [vmem:[#allocation13 + $0x70] sm:$0xff]  ;;  %v544_v21 = vld [vmem:[#allocation13 + $0x58] sm:$0xff] }
  0x7a   :  { %911 = vmatpush3.msra.mxu0 %v159_v23  ;;  %946 = vmatpush3.msra.mxu1 %v252_v24  ;;  %v543_v22 = vld [vmem:[#allocation13 + $0x50] sm:$0xff]  ;;  %v542_v23 = vld [vmem:[#allocation13 + $0x48] sm:$0xff]  ;;  %v541_v24 = vld [vmem:[#allocation13 + $0x40] sm:$0xff] }
  0x7b   :  { %912 = vmatprep.subr.mxu0 %v1278_v0  ;;  %947 = vmatprep.subr.mxu1 %v1278_v0 }
  0x7c   :  { %913 = vmatpush3.msra.mxu0 %v158_v25  ;;  %948 = vmatpush3.msra.mxu1 %v251_v26  ;;  %v540_v25 = vld [vmem:[#allocation13 + $0x38] sm:$0xff]  ;;  %v539_v26 = vld [vmem:[#allocation13 + $0x30] sm:$0xff] }
  0x7d   :  { %914 = vmatprep.subr.mxu0 %v1278_v0  ;;  %949 = vmatprep.subr.mxu1 %v1278_v0 }
  0x7e   :  { %915 = vmatpush3.msra.mxu0 %v157_v27  ;;  %950 = vmatpush3.msra.mxu1 %v250_v28  ;;  %v538_v27 = vld [vmem:[#allocation13 + $0x28] sm:$0xff]  ;;  %v537_v28 = vld [vmem:[#allocation13 + $0x20] sm:$0xff] }
  0x7f   :  { %916 = vmatprep.subr.mxu0 %v1278_v0  ;;  %951 = vmatprep.subr.mxu1 %v1278_v0 }
  0x80   :  { %917 = vmatpush3.msra.mxu0 %v156_v29  ;;  %952 = vmatpush3.msra.mxu1 %v249_v30  ;;  %v536_v29 = vld [vmem:[#allocation13 + $0x18] sm:$0xff]  ;;  %v535_v30 = vld [vmem:[#allocation13 + $0x10] sm:$0xff] }
  0x81   :  { %918 = vmatprep.subr.mxu0 %v1278_v0  ;;  %953 = vmatprep.subr.mxu1 %v1278_v0 }
  0x82   :  { %919 = vmatpush3.msra.mxu0 %v155_v31  ;;  %954 = vmatpush3.msra.mxu1 %v248_v32  ;;  %v534_v31 = vld [vmem:[#allocation13 + $0x8] sm:$0xff]  ;;  %v533_v32 = vld [vmem:[#allocation13] sm:$0xff] }
  0x83   :  { %921 = vmatmul.mubr.f32.vlgmr.msra.gmra.mxu0 %v1432_v33  ;;  %956 = vmatmul.mubr.f32.vlgmr.msra.gmra.mxu1 %v1432_v33 }
  0x84   :  { %993 = vmatprep.subr.mxu1 %v1278_v0  ;;  %958 = vmatprep.subr.mxu0 %v1278_v0 }
  0x85   :  { %994 = vmatpush3.msra.mxu1 %v455_v34  ;;  %959 = vmatpush3.msra.mxu0 %v362_v35 }
  0x86   :  { %995 = vmatprep.subr.mxu1 %v1278_v0  ;;  %960 = vmatprep.subr.mxu0 %v1278_v0 }
  0x87   :  { %996 = vmatpush3.msra.mxu1 %v454_v36  ;;  %961 = vmatpush3.msra.mxu0 %v361_v37  ;;  %v663_v36 = vld [vmem:[#allocation14 + $0xf8] sm:$0xff] }
  0x88   :  { %997 = vmatprep.subr.mxu1 %v1278_v0  ;;  %962 = vmatprep.subr.mxu0 %v1278_v0  ;;  %v647_v37 = vld [vmem:[#allocation14 + $0x78] sm:$0xff] }
  0x89   :  { %998 = vmatpush3.msra.mxu1 %v453_v38  ;;  %963 = vmatpush3.msra.mxu0 %v360_v39  ;;  %v662_v38 = vld [vmem:[#allocation14 + $0xf0] sm:$0xff] }
  0x8a   :  { %999 = vmatprep.subr.mxu1 %v1278_v0  ;;  %964 = vmatprep.subr.mxu0 %v1278_v0  ;;  %v646_v39 = vld [vmem:[#allocation14 + $0x70] sm:$0xff] }
  0x8b   :  { %1000 = vmatpush3.msra.mxu1 %v452_v40  ;;  %965 = vmatpush3.msra.mxu0 %v359_v41  ;;  %v661_v40 = vld [vmem:[#allocation14 + $0xe8] sm:$0xff] }
  0x8c   :  { %1001 = vmatprep.subr.mxu1 %v1278_v0  ;;  %966 = vmatprep.subr.mxu0 %v1278_v0  ;;  %v645_v41 = vld [vmem:[#allocation14 + $0x68] sm:$0xff] }
  0x8d   :  { %1002 = vmatpush3.msra.mxu1 %v451_v42  ;;  %967 = vmatpush3.msra.mxu0 %v358_v43  ;;  %v660_v42 = vld [vmem:[#allocation14 + $0xe0] sm:$0xff] }
  0x8e   :  { %1003 = vmatprep.subr.mxu1 %v1278_v0  ;;  %968 = vmatprep.subr.mxu0 %v1278_v0  ;;  %v644_v43 = vld [vmem:[#allocation14 + $0x60] sm:$0xff] }
  0x8f   :  { %1004 = vmatpush3.msra.mxu1 %v450_v44  ;;  %969 = vmatpush3.msra.mxu0 %v357_v45  ;;  %v658_v44 = vld [vmem:[#allocation14 + $0xd0] sm:$0xff] }
  0x90   :  { %1005 = vmatprep.subr.mxu1 %v1278_v0  ;;  %970 = vmatprep.subr.mxu0 %v1278_v0  ;;  %v642_v45 = vld [vmem:[#allocation14 + $0x50] sm:$0xff] }
  0x91   :  { %1006 = vmatpush3.msra.mxu1 %v449_v46  ;;  %971 = vmatpush3.msra.mxu0 %v356_v47  ;;  %v657_v46 = vld [vmem:[#allocation14 + $0xc8] sm:$0xff] }
  0x92   :  { %1007 = vmatprep.subr.mxu1 %v1278_v0  ;;  %972 = vmatprep.subr.mxu0 %v1278_v0  ;;  %v641_v47 = vld [vmem:[#allocation14 + $0x48] sm:$0xff] }
  0x93   :  { %1008 = vmatpush3.msra.mxu1 %v448_v48  ;;  %973 = vmatpush3.msra.mxu0 %v355_v49  ;;  %v656_v48 = vld [vmem:[#allocation14 + $0xc0] sm:$0xff] }
  0x94   :  { %1009 = vmatprep.subr.mxu1 %v1278_v0  ;;  %974 = vmatprep.subr.mxu0 %v1278_v0  ;;  %v640_v49 = vld [vmem:[#allocation14 + $0x40] sm:$0xff] }
  0x95   :  { %1010 = vmatpush3.msra.mxu1 %v447_v50  ;;  %975 = vmatpush3.msra.mxu0 %v354_v51  ;;  %v655_v50 = vld [vmem:[#allocation14 + $0xb8] sm:$0xff] }
  0x96   :  { %1011 = vmatprep.subr.mxu1 %v1278_v0  ;;  %976 = vmatprep.subr.mxu0 %v1278_v0  ;;  %v639_v51 = vld [vmem:[#allocation14 + $0x38] sm:$0xff] }
  0x97   :  { %1012 = vmatpush3.msra.mxu1 %v446_v52  ;;  %977 = vmatpush3.msra.mxu0 %v353_v53  ;;  %v654_v52 = vld [vmem:[#allocation14 + $0xb0] sm:$0xff] }
  0x98   :  { %1013 = vmatprep.subr.mxu1 %v1278_v0  ;;  %978 = vmatprep.subr.mxu0 %v1278_v0  ;;  %v638_v53 = vld [vmem:[#allocation14 + $0x30] sm:$0xff] }
  0x99   :  { %1014 = vmatpush3.msra.mxu1 %v445_v54  ;;  %1025 = vmatprep.mubr.msk.f32.mxu1 %vm1279_vm0, %v1278_v0  ;;  %v653_v54 = vld [vmem:[#allocation14 + $0xa8] sm:$0xff] }
  0x9a   :  { %1015 = vmatprep.subr.mxu1 %v1278_v0  ;;  %990 = vmatprep.mubr.msk.f32.mxu0 %vm1279_vm0, %v1278_v0 }
  0x9b   :  { %979 = vmatpush3.msra.mxu0 %v352_v55  ;;  %1016 = vmatpush3.msra.mxu1 %v444_v56  ;;  %v637_v55 = vld [vmem:[#allocation14 + $0x28] sm:$0xff]  ;;  %v652_v56 = vld [vmem:[#allocation14 + $0xa0] sm:$0xff] }
  0x9c   :  { %980 = vmatprep.subr.mxu0 %v1278_v0  ;;  %1017 = vmatprep.subr.mxu1 %v1278_v0 }
  0x9d   :  { %981 = vmatpush3.msra.mxu0 %v351_v57  ;;  %1018 = vmatpush3.msra.mxu1 %v443_v58  ;;  %v636_v57 = vld [vmem:[#allocation14 + $0x20] sm:$0xff]  ;;  %v651_v58 = vld [vmem:[#allocation14 + $0x98] sm:$0xff] }
  0x9e   :  { %982 = vmatprep.subr.mxu0 %v1278_v0  ;;  %1019 = vmatprep.subr.mxu1 %v1278_v0 }
  0x9f   :  { %983 = vmatpush3.msra.mxu0 %v350_v59  ;;  %1020 = vmatpush3.msra.mxu1 %v442_v60  ;;  %v635_v59 = vld [vmem:[#allocation14 + $0x18] sm:$0xff]  ;;  %v650_v60 = vld [vmem:[#allocation14 + $0x90] sm:$0xff] }
  0xa0   :  { %984 = vmatprep.subr.mxu0 %v1278_v0  ;;  %1021 = vmatprep.subr.mxu1 %v1278_v0 }
  0xa1   :  { %985 = vmatpush3.msra.mxu0 %v349_v61  ;;  %1022 = vmatpush3.msra.mxu1 %v441_v62  ;;  %v634_v61 = vld [vmem:[#allocation14 + $0x10] sm:$0xff]  ;;  %v649_v62 = vld [vmem:[#allocation14 + $0x88] sm:$0xff] }
  0xa2   :  { %986 = vmatprep.subr.mxu0 %v1278_v0  ;;  %1023 = vmatprep.subr.mxu1 %v1278_v0 }
  0xa3   :  { %987 = vmatpush3.msra.mxu0 %v348_v63  ;;  %1024 = vmatpush3.msra.mxu1 %v440_v1  ;;  %v633_v63 = vld [vmem:[#allocation14 + $0x8] sm:$0xff]  ;;  %v648_v1 = vld [vmem:[#allocation14 + $0x80] sm:$0xff] }
  0xa4   :  { %988 = vmatprep.subr.mxu0 %v1278_v0  ;;  %1026 = vmatmul.mubr.f32.vlgmr.msra.gmra.mxu1 %v1432_v33 }
  0xa5   :  { %989 = vmatpush3.msra.mxu0 %v347_v2  ;;  %735 = vmatprep.mubr.f32.mxu1 %v153_v3  ;;  %v632_v2 = vld [vmem:[#allocation14] sm:$0xff] }
  0xa6   :  { %1028 = vmatprep.subr.mxu0 %v1278_v0  ;;  %853 = vmatprep.subr.mxu1 %v663_v36 }
  0xa7   :  { %854 = vmatpush3.msra.mxu1 %v647_v37 }
  0xa8   :  { %855 = vmatprep.subr.mxu1 %v662_v38 }
  0xa9   :  { %856 = vmatpush3.msra.mxu1 %v646_v39 }
  0xaa   :  { %857 = vmatprep.subr.mxu1 %v661_v40 }
  0xab   :  { %858 = vmatpush3.msra.mxu1 %v645_v41 }
  0xac   :  { %859 = vmatprep.subr.mxu1 %v660_v42 }
  0xad   :  { %860 = vmatpush3.msra.mxu1 %v644_v43 }
 0x143   :  { %v244_v5 = vpop.f32.mrf.mxu0  ;;  %v337_v7 = vpop.f32.mrf.mxu1 }
 0x144   :  { %v245_v8 = vadd.f32 %v762_v4, %v244_v5  ;;  %v338_v12 = vadd.f32 %v763_v6, %v337_v7  ;;  %v765_v5 = vld [vmem:[%s1527_s9] ss:$0 sm:$0xff] }
 0x145   :  { %v922_v9 = vpop.f32.mrf.mxu0  ;;  %v957_v10 = vpop.f32.mrf.mxu1  ;;  %v764_v7 = vld [vmem:[%s1525_s7] ss:$0 sm:$0xff]  ;;  %s1280_s7 = smov [#allocation16]  }
 0x146   :  { %v341_v11 = vadd.f32 1.0, %v245_v8  ;;  %v766_v10 = vld [vmem:[%s1529_s11] ss:$0 sm:$0xff]  ;;  %s749_s21 = sshll.u32 %s1280_s7, 4  ;;  %s750_s21 = int_to_ptr.vmem [resolvable:$true] %s749_s21 }
 0x147   :  { %s1236_s11 = scalar_lea.vmem %s750_s21, 128  ;;  %p1241_p13 = scmp.lt.s32.totalorder %s750_s21, %s750_s21 }
 0x148   :  { %v342_v13 = vmul.f32 %v341_v11, %v153_v3  ;;  %p1237_p12 = scmp.ne.s32.totalorder %s750_s21, %s1236_s11  ;;  %p1242_p0 = scmp.lt.s32.totalorder %s1236_s11, %s1236_s11 }
 0x14a   :  { %v343_v14 = vadd.f32 %v342_v13, %v338_v12  ;;  %p1243_p1 = por %p1242_p0, %p1241_p13 }
 0x14c   :  { %v345_v15 = vmul.f32 0.2, %v343_v14  ;;  %vm344_vm1 = vcmp.ge.f32.partialorder %v343_v14, 0.0  ;;  %p1244_p2 = pnand %p1243_p1, %p1237_p12 }
 0x14e   :  { %v346_v17 = vsel %vm344_vm1, %v343_v14, %v345_v15 }
 0x14f   :  { %991 = vmatmul.mubr.f32.vlgmr.msra.gmra.mxu0 %v346_v17 }
 0x150   :  { %1029 = vmatpush3.msra.mxu0 %v548_v16  ;;  %1060 = vmatprep.mubr.msk.f32.mxu0 %vm1279_vm0, %v1278_v0 }
 0x151   :  { %1030 = vmatprep.subr.mxu0 %v1278_v0 }
 0x152   :  { %1031 = vmatpush3.msra.mxu0 %v547_v18 }
 0x153   :  { %1032 = vmatprep.subr.mxu0 %v1278_v0 }
 0x154   :  { %1033 = vmatpush3.msra.mxu0 %v546_v19  ;;  %v767_v19 = vld [vmem:[%s1531_s13] ss:$0 sm:$0xff] }
 0x155   :  { %1034 = vmatprep.subr.mxu0 %v1278_v0 }
 0x156   :  { %1035 = vmatpush3.msra.mxu0 %v545_v20 }
 0x157   :  { %1036 = vmatprep.subr.mxu0 %v1278_v0 }
 0x158   :  { %1037 = vmatpush3.msra.mxu0 %v544_v21 }
 0x159   :  { %1038 = vmatprep.subr.mxu0 %v1278_v0 }
 0x15a   :  { %1039 = vmatpush3.msra.mxu0 %v543_v22 }
 0x15b   :  { %1040 = vmatprep.subr.mxu0 %v1278_v0 }
 0x15c   :  { %1041 = vmatpush3.msra.mxu0 %v542_v23 }
 0x15d   :  { %1042 = vmatprep.subr.mxu0 %v1278_v0 }
 0x15e   :  { %1043 = vmatpush3.msra.mxu0 %v541_v24 }
 0x15f   :  { %1044 = vmatprep.subr.mxu0 %v1278_v0 }
 0x160   :  { %1045 = vmatpush3.msra.mxu0 %v540_v25 }
 0x161   :  { %1046 = vmatprep.subr.mxu0 %v1278_v0 }
 0x162   :  { %1047 = vmatpush3.msra.mxu0 %v539_v26 }
 0x163   :  { %1048 = vmatprep.subr.mxu0 %v1278_v0 }
 0x164   :  { %1049 = vmatpush3.msra.mxu0 %v538_v27  ;;  %v1500_v34 = vpop.f32.mrf.mxu1 }
 0x165   :  { %1050 = vmatprep.subr.mxu0 %v1278_v0  ;;  %v530_v6 = vadd.f32 %v765_v5, %v1500_v34 }
 0x166   :  { %1051 = vmatpush3.msra.mxu0 %v537_v28  ;;  %v1027_v35 = vpop.f32.mrf.mxu1 }
 0x167   :  { %1052 = vmatprep.subr.mxu0 %v1278_v0  ;;  %v626_v8 = vadd.f32 1.0, %v530_v6 }
 0x168   :  { %1053 = vmatpush3.msra.mxu0 %v536_v29 }
 0x169   :  { %1054 = vmatprep.subr.mxu0 %v1278_v0 }
 0x16a   :  { %1055 = vmatpush3.msra.mxu0 %v535_v30 }
 0x16b   :  { %1056 = vmatprep.subr.mxu0 %v1278_v0 }
 0x16c   :  { %1057 = vmatpush3.msra.mxu0 %v534_v31 }
 0x16d   :  { %1058 = vmatprep.subr.mxu0 %v1278_v0  ;;  %v659_v0 = vld [vmem:[#allocation14 + $0xd8] sm:$0xff] }
 0x16e   :  { %1059 = vmatpush3.msra.mxu0 %v533_v32  ;;  %861 = vmatprep.subr.mxu1 %v659_v0 }
 0x16f   :  { %1061 = vmatmul.mubr.f32.vlgmr.msra.gmra.mxu0 %v1432_v33  ;;  %v643_v33 = vld [vmem:[#allocation14 + $0x58] sm:$0xff] }
 0x170   :  { %862 = vmatpush3.msra.mxu1 %v643_v33 }
 0x171   :  { %863 = vmatprep.subr.mxu1 %v658_v44 }
 0x172   :  { %864 = vmatpush3.msra.mxu1 %v642_v45 }
 0x173   :  { %865 = vmatprep.subr.mxu1 %v657_v46 }
 0x174   :  { %866 = vmatpush3.msra.mxu1 %v641_v47 }
 0x175   :  { %867 = vmatprep.subr.mxu1 %v656_v48 }
 0x176   :  { %868 = vmatpush3.msra.mxu1 %v640_v49 }
 0x177   :  { %869 = vmatprep.subr.mxu1 %v655_v50 }
 0x178   :  { %870 = vmatpush3.msra.mxu1 %v639_v51 }
 0x179   :  { %871 = vmatprep.subr.mxu1 %v654_v52 }
 0x17a   :  { %872 = vmatpush3.msra.mxu1 %v638_v53 }
 0x17b   :  { %873 = vmatprep.subr.mxu1 %v653_v54 }
 0x17c   :  { %874 = vmatpush3.msra.mxu1 %v637_v55 }
 0x17d   :  { %875 = vmatprep.subr.mxu1 %v652_v56 }
 0x17e   :  { %876 = vmatpush3.msra.mxu1 %v636_v57 }
 0x17f   :  { %877 = vmatprep.subr.mxu1 %v651_v58 }
 0x180   :  { %878 = vmatpush3.msra.mxu1 %v635_v59 }
 0x181   :  { %879 = vmatprep.subr.mxu1 %v650_v60 }
 0x182   :  { %880 = vmatpush3.msra.mxu1 %v634_v61 }
 0x183   :  { %881 = vmatprep.subr.mxu1 %v649_v62 }
 0x184   :  { %882 = vmatpush3.msra.mxu1 %v633_v63 }
 0x185   :  { %883 = vmatprep.subr.mxu1 %v648_v1 }
 0x186   :  { %884 = vmatpush3.msra.mxu1 %v632_v2 }
 0x20f   :  { %v436_v3 = vpop.f32.mrf.mxu0 }
 0x210   :  { %v437_v9 = vadd.f32 %v764_v7, %v436_v3 }
 0x211   :  { %v992_v4 = vpop.f32.mrf.mxu0 }
 0x212   :  { %v627_v12 = vmul.f32 %v626_v8, %v437_v9 }
 0x22f   :  { %v622_v11 = vpop.f32.mrf.mxu0 }
 0x230   :  { %v623_v13 = vadd.f32 %v766_v10, %v622_v11 }
 0x231   :  { %v1062_v14 = vpop.f32.mrf.mxu0 }
 0x232   :  { %v628_v15 = vadd.f32 %v627_v12, %v623_v13 }
 0x234   :  { %v630_v16 = vmul.f32 0.2, %v628_v15  ;;  %vm629_vm2 = vcmp.ge.f32.partialorder %v628_v15, 0.0 }
 0x236   :  { %v631_v17 = vsel %vm629_vm2, %v628_v15, %v630_v16 }
 0x237   :  { %736 = vmatmul.mubr.f32.vlgmr.msra.gmra.mxu1 %v631_v17 }
 0x2f7   :  { %v885_v18 = vpop.f32.mrf.mxu1 }
 0x2f9   :  { %v886_v20 = vpop.f32.mrf.mxu1 }
 0x2fa   :  { %v887_v21 = vadd.f32 %v886_v20, %v885_v18 }
 0x2fc   :  { %v738_v22 = vadd.f32 %v887_v21, %v767_v19 }
 0x2fe   :  { %v741_v23 = vmul.f32 0.70710677, %v738_v22 }
 0x300   :  { %742 = vst [vmem:[#allocation16] sm:$0xff] %v741_v23 }
 0x301   :  { %1247 = shalt.err (!%p1244_p2)
}
 0x302   :  { %752 = dma.vmem_to_hbm [thread:$0]  %s750_s21, 128, %s1532_s14, [#allocation4]  }
 0x303   :  { %1266 = dma.done.wait [#allocation4], 128  }
 0x304   :  { %1267 = vsyncadd [#allocation4], 4294967168 }
 0x305   :  { %756 = vsyncpa [#allocation3], 1 }
 0x306   :  { %757 = vsyncpa [#allocation6], 1 }
 0x307   :  { %758 = vsyncpa [#allocation9], 1 }
 0x308   :  { %759 = vsyncpa [#allocation12], 1 }
 0x309   :  { %760 = vsyncpa [#allocation15], 1 }
 0x30a   :  { %761 = vsyncpa [#allocation4], 1 }

</bundles_post_ra>
